<compile_context>
chip_gen: v7x
topology: tpu7x:2x2x1
jax: 0.10.0
libtpu: 0.0.40
codegen_flags: <defaults>
</compile_context>

<pallas_src>
import functools

import jax
import jax.numpy as jnp
from jax.experimental import pallas as pl
from jax.experimental.pallas import tpu as pltpu


def _round_up(x, m):
    return (x + m - 1) // m * m


def _row_align(dtype):
    # Rows per packed sublane group: f32 -> 8, bf16 -> 16, int8/fp8 -> 32.
    itemsize = jnp.dtype(dtype).itemsize
    return 8 * max(1, 4 // max(itemsize, 1))


# --------------------------------------------------------------------------
# One-time hardware / capability probes (module level, NOT in the per-call path)
# --------------------------------------------------------------------------
def _tpu_vmem_and_cores():
    vmem = 64 * 1024 * 1024  # conservative default: v7x per-TC VMEM
    cores = 1
    try:
        info = pltpu.get_tpu_info()
        vmem = int(getattr(info, "vmem_capacity_bytes", vmem) or vmem)
        for attr in ("num_tensorcores", "tensorcore_count", "num_cores",
                     "core_count"):
            v = getattr(info, attr, None)
            if v:
                cores = int(v)
                break
    except Exception:
        pass
    if cores == 1:
        # Fallback multi-TC detection (megacore v4/v5p, v7x) from device_kind.
        try:
            kind = jax.devices()[0].device_kind.lower()
            if any(tag in kind for tag in ("v4", "v5p", "7x", "v7")):
                cores = 2
        except Exception:
            pass
    return vmem, cores


_VMEM_CAPACITY, _NUM_TENSORCORES = _tpu_vmem_and_cores()
# Headroom for compiler-internal scratch: 48 MiB on 64 MiB parts (v7x),
# ~96 MiB on 128 MiB parts (v5e / v6e).
_VMEM_LIMIT = int(min(0.75 * _VMEM_CAPACITY, 100 * 1024 * 1024))


def _probe_single_buffered_weights():
    """One-time check that pipeline_mode=pl.Buffered(1) on a grid-invariant
    operand lowers, compiles and produces correct results on this build."""
    if not hasattr(pl, "Buffered"):
        return False
    try:
        def _k(x_ref, w_ref, o_ref):
            o_ref[...] = x_ref[...] + w_ref[...]

        fn = pl.pallas_call(
            _k,
            out_shape=jax.ShapeDtypeStruct((16, 128), jnp.float32),
            grid=(2,),
            in_specs=[
                pl.BlockSpec((8, 128), lambda i: (i, 0)),
                pl.BlockSpec((8, 128), lambda i: (0, 0),
                             pipeline_mode=pl.Buffered(1)),
            ],
            out_specs=pl.BlockSpec((8, 128), lambda i: (i, 0)),
        )
        x = jnp.arange(16 * 128, dtype=jnp.float32).reshape(16, 128)
        w = jnp.ones((8, 128), jnp.float32)
        out = jax.jit(fn)(x, w)
        ref = x + jnp.tile(w, (2, 1))
        return bool(jnp.max(jnp.abs(out - ref)) == 0.0)
    except Exception:
        return False


_WEIGHTS_SINGLE_BUFFERED = _probe_single_buffered_weights()


# --------------------------------------------------------------------------
# Kernel
# --------------------------------------------------------------------------
def _linear_skip_kernel(x_ref, wA_ref, bA_ref, wB_ref, bB_ref, *rest,
                        negative_slope, useln, ln_eps):
    if useln:
        g_ref, beta_ref, o_ref = rest
    else:
        (o_ref,) = rest

    x = x_ref[...]                                   # native dtype -> MXU

    # linA: (tm, D) @ (D, H), f32 accumulation on the MXU.
    h = jnp.dot(x, wA_ref[...], preferred_element_type=jnp.float32)
    h = h + bA_ref[...].astype(jnp.float32)
    h = jnp.where(h >= 0.0, h, negative_slope * h)   # LeakyReLU(0.01)

    # linB: cast intermediate back to weight dtype (native-width MXU operands).
    y = jnp.dot(h.astype(wB_ref.dtype), wB_ref[...],
                preferred_element_type=jnp.float32)
    y = y + bB_ref[...].astype(jnp.float32)

    r = y + x.astype(jnp.float32)                    # skip connection

    if useln:
        # Two-pass LayerNorm statistics in f32 (numerically safe).
        mean = jnp.mean(r, axis=-1, keepdims=True)
        cen = r - mean
        var = jnp.mean(cen * cen, axis=-1, keepdims=True)
        out = cen * jax.lax.rsqrt(var + ln_eps)
        out = (out * g_ref[...].astype(jnp.float32)
               + beta_ref[...].astype(jnp.float32))
    else:
        out = r * 0.5

    o_ref[...] = out.astype(o_ref.dtype)


# --------------------------------------------------------------------------
# Jitted wrapper (pad rows -> pallas_call -> slice, all fused under jit)
# --------------------------------------------------------------------------
@functools.partial(jax.jit, static_argnames=("useln", "negative_slope", "ln_eps"))
def linear_skip(x, wA, bA, wB, bB, ln_gamma=None, ln_beta=None, *,
                useln=False, negative_slope=0.01, ln_eps=1e-5):
    """x: (N, D) -> (N, D).  wA: (D, H), wB: (H, D)."""
    N, D = x.shape
    Dw, H = wA.shape
    assert Dw == D and wB.shape == (H, D)
    bA = bA.reshape(1, H)
    bB = bB.reshape(1, D)
    if useln:
        assert ln_gamma is not None and ln_beta is not None
        ln_gamma = ln_gamma.reshape(1, D)
        ln_beta = ln_beta.reshape(1, D)

    x_bytes = jnp.dtype(x.dtype).itemsize
    w_bytes = jnp.dtype(wA.dtype).itemsize
    align = _row_align(x.dtype)

    # Resident weights/biases (+gamma/beta) VMEM footprint.
    n_weight_elems = D * H * 2 + H + D * (5 if useln else 3)
    weight_bytes = n_weight_elems * w_bytes * (1 if _WEIGHTS_SINGLE_BUFFERED else 2)

    # Per-row VMEM: double-buffered x & out tiles (native dtype) + f32
    # intermediates (h is (tm, H); y / r / out are (tm, D)).
    per_row = 2 * (2 * D * x_bytes) + (H + 3 * D) * 4
    budget = max(_VMEM_LIMIT // 2 - weight_bytes, 64 * 1024)

    # Grow the row tile toward the VMEM budget (fewer grid steps, bigger DMAs),
    # aligned to the dtype's sublane packing and capped at 2048 rows / N.
    tm = budget // per_row
    tm = max(align, min(tm, 2048, _round_up(N, align)))
    tm = max(align, (tm // align) * align)

    grid_len = pl.cdiv(N, tm)
    # Balance grid steps across TensorCores only on multi-TC parts (v7x /
    # megacore); on single-TC v5e/v6e halving tm just doubles sequential steps.
    if (_NUM_TENSORCORES > 1 and grid_len > 1 and grid_len % 2 == 1
            and tm >= 2 * align):
        tm = max(align, (tm // 2 // align) * align)
        grid_len = pl.cdiv(N, tm)

    N_pad = grid_len * tm
    x_p = jnp.pad(x, ((0, N_pad - N), (0, 0))) if N_pad != N else x

    if _WEIGHTS_SINGLE_BUFFERED:
        def wspec(shape):
            # Grid-invariant residents: single-buffer to save VMEM (v7x).
            return pl.BlockSpec(shape, lambda i: (0, 0),
                                pipeline_mode=pl.Buffered(1))
    else:
        def wspec(shape):
            return pl.BlockSpec(shape, lambda i: (0, 0))

    # x / out keep the TRUE feature width D (block dim == full array dim), so
    # no extra HBM bytes are read/written for the mem-bound row streams.
    in_specs = [
        pl.BlockSpec((tm, D), lambda i: (i, 0)),     # x row tile
        wspec((D, H)),                               # wA
        wspec((1, H)),                               # bA
        wspec((H, D)),                               # wB
        wspec((1, D)),                               # bB
    ]
    args = [x_p, wA, bA, wB, bB]
    if useln:
        in_specs += [wspec((1, D)), wspec((1, D))]
        args += [ln_gamma, ln_beta]

    cost = pl.CostEstimate(
        flops=int(4 * N_pad * D * H),                          # two matmuls
        transcendentals=int(N_pad if useln else 0),            # rsqrt per row
        bytes_accessed=int(n_weight_elems * w_bytes + 2 * N_pad * D * x_bytes))

    kernel = functools.partial(
        _linear_skip_kernel, negative_slope=negative_slope, useln=useln,
        ln_eps=ln_eps)

    out = pl.pallas_call(
        kernel,
        out_shape=jax.ShapeDtypeStruct((N_pad, D), x.dtype),
        grid_spec=pltpu.PrefetchScalarGridSpec(
            num_scalar_prefetch=0,
            grid=(grid_len,),
            in_specs=in_specs,
            out_specs=pl.BlockSpec((tm, D), lambda i: (i, 0)),
        ),
        compiler_params=pltpu.CompilerParams(
            dimension_semantics=("parallel",),
            vmem_limit_bytes=_VMEM_LIMIT),
        cost_estimate=cost,
    )(*args)

    return out[:N] if N_pad != N else out


# --------------------------------------------------------------------------
# Pure-JAX reference
# --------------------------------------------------------------------------
def linear_skip_ref(x, wA, bA, wB, bB, ln_gamma=None, ln_beta=None, *,
                    useln=False, negative_slope=0.01, ln_eps=1e-5):
    xf = x.astype(jnp.float32)
    h = xf @ wA.astype(jnp.float32) + bA.astype(jnp.float32).reshape(1, -1)
    h = jnp.where(h >= 0, h, negative_slope * h)
    y = h @ wB.astype(jnp.float32) + bB.astype(jnp.float32).reshape(1, -1)
    r = y + xf
    if useln:
        mean = jnp.mean(r, axis=-1, keepdims=True)
        var = jnp.mean((r - mean) ** 2, axis=-1, keepdims=True)
        return ((r - mean) / jnp.sqrt(var + ln_eps)
                * ln_gamma.astype(jnp.float32).reshape(1, -1)
                + ln_beta.astype(jnp.float32).reshape(1, -1))
    return r / 2.0


if __name__ == "__main__":
    # Small shapes consistent with the module: dim=32, hdim=2*dim=64,
    # batch=2, seq=8 -> N=16 rows after flattening.
    batch, seq, dim = 2, 8, 32
    hdim = 2 * dim

    key = jax.random.PRNGKey(0)
    kx, kwa, kba, kwb, kbb = jax.random.split(key, 5)

    x = jax.random.normal(kx, (batch, seq, dim), dtype=jnp.float32)
    x = x.reshape(batch * seq, dim)

    limA = 1.0 / (dim ** 0.5)
    limB = 1.0 / (hdim ** 0.5)
    wA = jax.random.uniform(kwa, (dim, hdim), minval=-limA, maxval=limA,
                            dtype=jnp.float32)
    bA = jax.random.uniform(kba, (hdim,), minval=-limA, maxval=limA,
                            dtype=jnp.float32)
    wB = jax.random.uniform(kwb, (hdim, dim), minval=-limB, maxval=limB,
                            dtype=jnp.float32)
    bB = jax.random.uniform(kbb, (dim,), minval=-limB, maxval=limB,
                            dtype=jnp.float32)
    ln_gamma = jnp.ones((dim,), dtype=jnp.float32)
    ln_beta = jnp.zeros((dim,), dtype=jnp.float32)

    # TODO(synk): _Encoder's recurrent RNN over pack_padded_sequence (masked,
    # time-step-sequential) and the bidirectional hidden-state concat have no
    # clean single Pallas feed-forward equivalent; only the dense MLP+skip/LN
    # path is implemented, and dropout is identity (p=0.0 / eval mode).

    # f32 correctness at the module's small shapes.
    for useln in (False, True):
        out = jax.block_until_ready(
            linear_skip(x, wA, bA, wB, bB, ln_gamma, ln_beta, useln=useln))
        ref = linear_skip_ref(x, wA, bA, wB, bB, ln_gamma, ln_beta, useln=useln)
        assert out.shape == (batch * seq, dim)
        assert jnp.max(jnp.abs(out - ref)) < 1e-4, f"f32 mismatch (useln={useln})"

    # bf16 path with more rows: exercises large row tiles, sublane-aligned tm,
    # native bf16 MXU operands with f32 accumulation, true-D (32-lane) output.
    Nb = 512
    xb = jax.random.normal(jax.random.PRNGKey(1), (Nb, dim),
                           dtype=jnp.float32).astype(jnp.bfloat16)
    wAb, bAb = wA.astype(jnp.bfloat16), bA.astype(jnp.bfloat16)
    wBb, bBb = wB.astype(jnp.bfloat16), bB.astype(jnp.bfloat16)
    gb, bb = ln_gamma.astype(jnp.bfloat16), ln_beta.astype(jnp.bfloat16)
    for useln in (False, True):
        outb = jax.block_until_ready(
            linear_skip(xb, wAb, bAb, wBb, bBb, gb, bb, useln=useln))
        refb = linear_skip_ref(xb, wAb, bAb, wBb, bBb, gb, bb, useln=useln)
        assert outb.shape == (Nb, dim)
        assert outb.dtype == jnp.bfloat16
        err = jnp.max(jnp.abs(outb.astype(jnp.float32) - refb))
        assert err < 0.15, f"bf16 mismatch (useln={useln}): {err}"

    print("KERNEL_OK")
</pallas_src>

<mosaic_0001>
module attributes {stable_mosaic.version = 11 : i64} {
  func.func @_k(%arg0: i32, %arg1: memref<8x128xf32, #tpu.memory_space<vmem>>, %arg2: memref<8x128xf32, #tpu.memory_space<vmem>>, %arg3: memref<8x128xf32, #tpu.memory_space<vmem>>) attributes {dimension_semantics = [#tpu.dimension_semantics<arbitrary>], iteration_bounds = array<i64: 2>, scalar_prefetch = 0 : i64, scratch_operands = 0 : i64, tpu.core_type = #tpu.core_type<tc>, window_params = [{transform_indices = @transform_0, window_bounds = array<i64: 8, 128>}, {pipeline_mode = #tpu.pipeline_mode<synchronous>, transform_indices = @transform_1, window_bounds = array<i64: 8, 128>}, {transform_indices = @transform_2, window_bounds = array<i64: 8, 128>}]} {
    %c0 = arith.constant 0 : index
    %c0_0 = arith.constant 0 : index
    %0 = vector.load %arg1[%c0, %c0_0] : memref<8x128xf32, #tpu.memory_space<vmem>>, vector<8x128xf32>
    %c0_1 = arith.constant 0 : index
    %c0_2 = arith.constant 0 : index
    %1 = vector.load %arg2[%c0_1, %c0_2] : memref<8x128xf32, #tpu.memory_space<vmem>>, vector<8x128xf32>
    %2 = arith.addf %0, %1 : vector<8x128xf32>
    %c0_3 = arith.constant 0 : index
    %c0_4 = arith.constant 0 : index
    %3 = vector.load %arg3[%c0_3, %c0_4] : memref<8x128xf32, #tpu.memory_space<vmem>>, vector<8x128xf32>
    tpu.vector_store %arg3[%c0_3, %c0_4], %2 {strides = array<i32>} : memref<8x128xf32, #tpu.memory_space<vmem>>, vector<8x128xf32>,
    return
  }
  func.func @transform_0(%arg0: i32) -> (i32, i32) {
    %c0_i32 = arith.constant 0 : i32
    %c0_i32_0 = arith.constant 0 : i32
    return %arg0, %c0_i32 : i32, i32
  }
  func.func @transform_1(%arg0: i32) -> (i32, i32) {
    %c0_i32 = arith.constant 0 : i32
    %c0_i32_0 = arith.constant 0 : i32
    %c0_i32_1 = arith.constant 0 : i32
    return %c0_i32, %c0_i32_0 : i32, i32
  }
  func.func @transform_2(%arg0: i32) -> (i32, i32) {
    %c0_i32 = arith.constant 0 : i32
    %c0_i32_0 = arith.constant 0 : i32
    return %arg0, %c0_i32 : i32, i32
  }
}

module attributes {stable_mosaic.version = 11 : i64} {
  func.func @_linear_skip_kernel(%arg0: i32, %arg1: memref<16x32xf32, #tpu.memory_space<vmem>>, %arg2: memref<32x64xf32, #tpu.memory_space<vmem>>, %arg3: memref<1x64xf32, #tpu.memory_space<vmem>>, %arg4: memref<64x32xf32, #tpu.memory_space<vmem>>, %arg5: memref<1x32xf32, #tpu.memory_space<vmem>>, %arg6: memref<16x32xf32, #tpu.memory_space<vmem>>) attributes {dimension_semantics = [#tpu.dimension_semantics<parallel>], iteration_bounds = array<i64: 1>, scalar_prefetch = 0 : i64, scratch_operands = 0 : i64, tpu.core_type = #tpu.core_type<tc>, window_params = [{transform_indices = @transform_0, window_bounds = array<i64: 16, 32>}, {pipeline_mode = #tpu.pipeline_mode<synchronous>, transform_indices = @transform_1, window_bounds = array<i64: 32, 64>}, {pipeline_mode = #tpu.pipeline_mode<synchronous>, transform_indices = @transform_2, window_bounds = array<i64: 1, 64>}, {pipeline_mode = #tpu.pipeline_mode<synchronous>, transform_indices = @transform_3, window_bounds = array<i64: 64, 32>}, {pipeline_mode = #tpu.pipeline_mode<synchronous>, transform_indices = @transform_4, window_bounds = array<i64: 1, 32>}, {transform_indices = @transform_5, window_bounds = array<i64: 16, 32>}]} {
    %c0 = arith.constant 0 : index
    %c0_0 = arith.constant 0 : index
    %0 = vector.load %arg1[%c0, %c0_0] : memref<16x32xf32, #tpu.memory_space<vmem>>, vector<16x32xf32>
    %c0_1 = arith.constant 0 : index
    %c0_2 = arith.constant 0 : index
    %1 = vector.load %arg2[%c0_1, %c0_2] : memref<32x64xf32, #tpu.memory_space<vmem>>, vector<32x64xf32>
    %cst = arith.constant dense<0.000000e+00> : vector<16x64xf32>
    %2 = tpu.matmul %0, %1, %cst {dimension_numbers = #tpu.dot_dimension_numbers<[1], [0], [0], [1], [0, 0, 1, 1], [], []>} : vector<16x32xf32>, vector<32x64xf32>, vector<16x64xf32> -> vector<16x64xf32>
    %c0_3 = arith.constant 0 : index
    %c0_4 = arith.constant 0 : index
    %3 = vector.load %arg3[%c0_3, %c0_4] : memref<1x64xf32, #tpu.memory_space<vmem>>, vector<1x64xf32>
    %4 = vector.broadcast %3 : vector<1x64xf32> to vector<16x64xf32>
    %5 = arith.addf %2, %4 : vector<16x64xf32>
    %cst_5 = arith.constant 0.000000e+00 : f32
    %6 = vector.broadcast %cst_5 : f32 to vector<16x64xf32>
    %7 = arith.cmpf oge, %5, %6 : vector<16x64xf32>
    %cst_6 = arith.constant 0.00999999977 : f32
    %8 = vector.broadcast %cst_6 : f32 to vector<16x64xf32>
    %9 = arith.mulf %8, %5 : vector<16x64xf32>
    %10 = arith.select %7, %5, %9 : vector<16x64xi1>, vector<16x64xf32>
    %c0_7 = arith.constant 0 : index
    %c0_8 = arith.constant 0 : index
    %11 = vector.load %arg4[%c0_7, %c0_8] : memref<64x32xf32, #tpu.memory_space<vmem>>, vector<64x32xf32>
    %cst_9 = arith.constant dense<0.000000e+00> : vector<16x32xf32>
    %12 = tpu.matmul %10, %11, %cst_9 {dimension_numbers = #tpu.dot_dimension_numbers<[1], [0], [0], [1], [0, 0, 1, 1], [], []>} : vector<16x64xf32>, vector<64x32xf32>, vector<16x32xf32> -> vector<16x32xf32>
    %c0_10 = arith.constant 0 : index
    %c0_11 = arith.constant 0 : index
    %13 = vector.load %arg5[%c0_10, %c0_11] : memref<1x32xf32, #tpu.memory_space<vmem>>, vector<1x32xf32>
    %14 = vector.broadcast %13 : vector<1x32xf32> to vector<16x32xf32>
    %15 = arith.addf %12, %14 : vector<16x32xf32>
    %16 = arith.addf %15, %0 : vector<16x32xf32>
    %cst_12 = arith.constant 5.000000e-01 : f32
    %17 = vector.broadcast %cst_12 : f32 to vector<16x32xf32>
    %18 = arith.mulf %16, %17 : vector<16x32xf32>
    %c0_13 = arith.constant 0 : index
    %c0_14 = arith.constant 0 : index
    %19 = vector.load %arg6[%c0_13, %c0_14] : memref<16x32xf32, #tpu.memory_space<vmem>>, vector<16x32xf32>
    tpu.vector_store %arg6[%c0_13, %c0_14], %18 {strides = array<i32>} : memref<16x32xf32, #tpu.memory_space<vmem>>, vector<16x32xf32>,
    return
  }
  func.func @transform_0(%arg0: i32) -> (i32, i32) {
    %c0_i32 = arith.constant 0 : i32
    %c0_i32_0 = arith.constant 0 : i32
    return %arg0, %c0_i32 : i32, i32
  }
  func.func @transform_1(%arg0: i32) -> (i32, i32) {
    %c0_i32 = arith.constant 0 : i32
    %c0_i32_0 = arith.constant 0 : i32
    %c0_i32_1 = arith.constant 0 : i32
    return %c0_i32, %c0_i32_0 : i32, i32
  }
  func.func @transform_2(%arg0: i32) -> (i32, i32) {
    %c0_i32 = arith.constant 0 : i32
    %c0_i32_0 = arith.constant 0 : i32
    %c0_i32_1 = arith.constant 0 : i32
    return %c0_i32, %c0_i32_0 : i32, i32
  }
  func.func @transform_3(%arg0: i32) -> (i32, i32) {
    %c0_i32 = arith.constant 0 : i32
    %c0_i32_0 = arith.constant 0 : i32
    %c0_i32_1 = arith.constant 0 : i32
    return %c0_i32, %c0_i32_0 : i32, i32
  }
  func.func @transform_4(%arg0: i32) -> (i32, i32) {
    %c0_i32 = arith.constant 0 : i32
    %c0_i32_0 = arith.constant 0 : i32
    %c0_i32_1 = arith.constant 0 : i32
    return %c0_i32, %c0_i32_0 : i32, i32
  }
  func.func @transform_5(%arg0: i32) -> (i32, i32) {
    %c0_i32 = arith.constant 0 : i32
    %c0_i32_0 = arith.constant 0 : i32
    return %arg0, %c0_i32 : i32, i32
  }
}

</mosaic_0001>

<bundles_post_ra>
// kernel: tpu_custom_call.1
= control target key start
LH: loop header
LB: loop body
LE: loop exit
PB: predicated region body
PF: predicated region fallthrough
CT: control target
= control target key end

     0   :  { %7 = vsyncpa [#allocation3], 0  ;;  %s690_s0 = inlined_call_operand.hbm [shape: f32[16,128], index: 0, kind: input, shape index: {}]   ;;  %s691_s1 = inlined_call_operand.hbm [shape: f32[8,128], index: 1, kind: input, shape index: {}]   ;;  %s692_s2 = inlined_call_operand.hbm [shape: f32[16,128], index: 2, kind: output, shape index: {}]  }
   0x1   :  { %9 = vsyncpa [#allocation3 + $0x1], 0 }
   0x2   :  { %10 = vsyncpa [#allocation6], 0 }
   0x3   :  { %11 = vsyncpa [#allocation4], 0 }
   0x4   :  { %13 = vsyncpa [#allocation4 + $0x1], 0  ;;  %s489_s9 = smov 0   ;;  %s491_s10 = smov 0  }
   0x5   :  { %s493_s11 = smov 0   ;;  %s495_s12 = smov 0  }
   0x6 LB: > { %s510_s13 = sadd.s32 4294967295, %s469_s12   ;;  %s270_s14 = sadd.s32 4294967294, %s469_s12   ;;  %s469_s12 = sphi %s495_s12, %s716_s12   ;;  %s465_s11 = sphi %s493_s11, %s715_s11   ;;  %s461_s10 = sphi %s491_s10, %s714_s10   ;;  %s457_s9 = sphi %s489_s9, %s713_s9  }
   0x7   : > { %p39_p0 = scmp.ne.s32.totalorder %s461_s10, %s457_s9  ;;  %p693_p1 = scmp.eq.s32.totalorder %s510_s13, 0 }
   0x8   : > { %p90_p3 = scmp.eq.s32.totalorder %s270_s14, 1  ;;  %p271_p5 = scmp.ge.s32.totalorder %s469_s12, 1 }
   0x9   : > { %p519_p4 = por %p693_p1, %p39_p0  ;;  %p97_p7 = scmp.lt.s32.totalorder %s469_s12, 3 }
   0xa   : > { %p524_p6 = por %p90_p3, %p39_p0  ;;  %s471_s18 = smov [#allocation5]  }
   0xb   : > { %s696_s15 = scalar_select %p519_p4, 1, 0 }
   0xc   : > { %s697_s16 = scalar_select %p524_p6, 1, 0 }
   0xd   : > { %p529_p8 = pnand %p271_p5, %p97_p7  ;;  %s110_s19 = sshll.u32 %s471_s18, 4  ;;  %s111_s19 = int_to_ptr.vmem [resolvable:$true] %s110_s19 }
   0xe   : > { %s537_s20 = sadd.s32 1, %s469_s12   ;;  %s26_s24 = sadd.s32 1, %s465_s11 }
   0xf   : > { %s698_s17 = scalar_select %p529_p8, 1, 0 }
  0x10   : > { %p292_p10 = pneg %p529_p8  ;;  %s23_s22 = ssub.s32 %s469_s12, %s537_s20 }
  0x11   : > { %p547_p12 = scmp.eq.s32.totalorder %s23_s22, 0  ;;  %s341_s27 = scalar_lea.hbm %s691_s1, 128 }
  0x12   : > { %p541_p11 = pnand %p292_p10, %p693_p1  ;;  %p342_p0 = scmp.ne.s32.totalorder %s691_s1, %s341_s27 }
  0x13   : > { %s700_s23 = scalar_select %p547_p12, 1, 0 }
  0x14   : > { %p343_p3 = pneg %p541_p11  ;;  %p348_p10 = scmp.lt.u32.totalorder %s341_s27, %s691_s1 }
  0x16   : > { %p344_p5 = pnand %p343_p3, %p342_p0 }
  0x18   : > { %p345_p7 = pneg %p344_p5 }
  0x1a   : > { %p350_p9 = pnand %p348_p10, %p345_p7 }
  0x1c   : > { %353 = shalt.err (!%p350_p9)
}
  0x1d   : > { %s354_s4 = scalar_lea.vmem %s111_s19, 128  ;;  %p362_p6 = scmp.lt.s32.totalorder %s111_s19, %s111_s19 }
  0x1e   : > { %p355_p1 = scmp.ne.s32.totalorder %s111_s19, %s354_s4  ;;  %p363_p4 = scmp.lt.s32.totalorder %s354_s4, %s354_s4 }
  0x20   : > { %p357_p2 = pnand %p355_p1, %p343_p3  ;;  %p364_p8 = por %p363_p4, %p362_p6 }
  0x22   : > { %p358_p13 = pneg %p357_p2 }
  0x24   : > { %p365_p12 = pnand %p364_p8, %p358_p13 }
  0x26   : > { %368 = shalt.err (!%p365_p12)
}
  0x27   : > { %295 = dma.hbm_to_vmem [thread:$0]  (!%p541_p11), %s691_s1, 128, %s111_s19, [#allocation6]  }
  0x28   : > { %p701_p1 = scmp.ne.s32.totalorder %s700_s23, 0  ;;  %p34_p2 = scmp.eq.s32.totalorder %s469_s12, 0 }
  0x29   : > { %p702_p4 = scmp.ne.s32.totalorder %s465_s11, %s461_s10  ;;  %p703_p6 = scmp.eq.s32.totalorder %s510_s13, 1 }
  0x2a   : > { %s573_s7 = scalar_select %p701_p1, %s465_s11, %s26_s24  }
  0x2b   : > { %p581_p8 = por %p703_p6, %p702_p4  ;;  %p305_p9 = scmp.lt.s32.totalorder %s469_s12, 2 }
  0x2c   : > { %s121_s14 = sand.u32 1, %s465_s11   ;;  %p705_p12 = pmov %p702_p4 }
  0x2d   : > { %s274_s18 = sshll.u32 %s121_s14, 3  ;;  %s275_s21 = sshll.u32 %s469_s12, 7 }
  0x2e   : > { %p35_p13 = por %p34_p2, %p705_p12  ;;  %s594_s19 = scalar_lea.hbm %s690_s0, %s275_s21 }
  0x2f   : > { %s125_s23 = scalar_lea.vmem [#allocation2], %s274_s18  ;;  %s122_s27 = scalar_lea.sflag [#allocation3], %s121_s14 }
  0x30   : > { %s132_s24 = sshll.u32 %s125_s23, 4  ;;  %p596_p11 = pnand %p305_p9, %p35_p13  ;;  %s600_s24 = int_to_ptr.vmem [resolvable:$true] %s132_s24 }
  0x31   : > { %s369_s28 = scalar_lea.hbm %s594_s19, 128  ;;  %s374_s3 = scalar_lea.hbm %s690_s0, 256 }
  0x32   : > { %p370_p0 = scmp.ne.s32.totalorder %s594_s19, %s369_s28  ;;  %p371_p3 = pneg %p596_p11 }
  0x33   : > { %p375_p10 = scmp.lt.u32.totalorder %s594_s19, %s690_s0  ;;  %p376_p1 = scmp.lt.u32.totalorder %s374_s3, %s369_s28 }
  0x34   : > { %p372_p5 = pnand %p371_p3, %p370_p0  ;;  %p378_p4 = scmp.lt.u32.totalorder %s369_s28, %s594_s19 }
  0x35   : > { %p377_p2 = por %p376_p1, %p375_p10 }
  0x36   : > { %p373_p7 = pneg %p372_p5 }
  0x37   : > { %p379_p6 = por %p378_p4, %p377_p2 }
  0x39   : > { %p380_p9 = pnand %p379_p6, %p373_p7 }
  0x3b   : > { %383 = shalt.err (!%p380_p9)
}
  0x3c   : > { %s384_s6 = scalar_lea.vmem %s600_s24, 128  ;;  %s472_s14 = smov [#allocation2]  }
  0x3d   : > { %p385_p12 = scmp.ne.s32.totalorder %s600_s24, %s384_s6  ;;  %s389_s18 = sshll.u32 %s472_s14, 4  ;;  %s390_s18 = int_to_ptr.vmem [resolvable:$false] %s389_s18 }
  0x3e   : > { %s391_s21 = scalar_lea.vmem %s390_s18, 256  ;;  %p392_p5 = scmp.lt.s32.totalorder %s600_s24, %s390_s18 }
  0x3f   : > { %p387_p13 = pnand %p385_p12, %p371_p3  ;;  %p393_p10 = scmp.lt.s32.totalorder %s391_s21, %s384_s6 }
  0x41   : > { %p388_p0 = pneg %p387_p13  ;;  %p394_p1 = por %p393_p10, %p392_p5 }
  0x43   : > { %p395_p2 = pnand %p394_p1, %p388_p0 }
  0x45   : > { %398 = shalt.err (!%p395_p2)
}
  0x46   : > { %299 = dma.hbm_to_vmem [thread:$0]  (!%p596_p11), %s594_s19, 128, %s600_s24, %s122_s27  }
  0x47   : > { %p707_p7 = scmp.ne.s32.totalorder %s698_s17, 0 }
  0x48   : > { %s630_s22 = sand.u32 (!%p707_p7), 1, %s461_s10   ;;  %p708_p3 = scmp.ne.s32.totalorder (!%p707_p7), %s696_s15, 0 }
  0x49   : > { %141 = sbr.rel (%p707_p7) target bundleno = 109 (0x6d), region = 28  ;;  %s277_s25 = sshll.u32 (!%p707_p7), %s630_s22, 3 }
  0x4a   : > { %s144_s23 = scalar_lea.sflag (!%p707_p7), [#allocation3], %s630_s22  ;;  %s147_s28 = scalar_lea.vmem (!%p707_p7), [#allocation2], %s277_s25 }
  0x50   : > { %444 = dma.done.wait (%p708_p3), %s144_s23, 128  }
  0x51   : > { %446 = vsyncadd (%p708_p3), %s144_s23, 4294967168  ;;  %p709_p4 = scmp.eq.s32.totalorder %s510_s13, 0 }
  0x53   : > { %448 = dma.done.wait (%p709_p4), [#allocation6], 128   ;;  %p710_p11 = pmov %p709_p4 }
  0x54   : > { %s171_s17 = scalar_lea.vmem [#allocation7], %s277_s25  ;;  %s281_s24 = sshll.u32 %s510_s13, 7  ;;  %v172_v0 = vld [vmem:[%s147_s28] sm:$0xff]  ;;  %v173_v1 = vld [vmem:[#allocation5] sm:$0xff] }
  0x55   : > { %450 = vsyncadd (%p710_p11), [#allocation6], 4294967168  ;;  %s190_s19 = sshll.u32 %s171_s17, 4  ;;  %v174_v2 = vadd.f32 %v173_v1, %v172_v0  ;;  %s648_s27 = scalar_lea.hbm %s692_s2, %s281_s24  ;;  %s643_s19 = int_to_ptr.vmem [resolvable:$true] %s190_s19 }
  0x56   : > { %s177_s29 = scalar_lea.sflag [#allocation4], %s630_s22  ;;  %s399_s30 = scalar_lea.vmem %s643_s19, 128 }
  0x57   : > { %175 = vst [vmem:[%s171_s17] sm:$0xff] %v174_v2  ;;  %p400_p6 = scmp.ne.s32.totalorder %s643_s19, %s399_s30  ;;  %s473_s13 = smov [#allocation7]  }
  0x58   : > { %s403_s3 = sshll.u32 %s473_s13, 4  ;;  %s404_s3 = int_to_ptr.vmem [resolvable:$false] %s403_s3 }
  0x59   : > { %p401_p9 = pnand %p400_p6, %p581_p8  ;;  %s405_s4 = scalar_lea.vmem %s404_s3, 256 }
  0x5a   : > { %p406_p13 = scmp.lt.s32.totalorder %s643_s19, %s404_s3  ;;  %p407_p0 = scmp.lt.s32.totalorder %s405_s4, %s399_s30 }
  0x5b   : > { %p402_p12 = pneg %p401_p9 }
  0x5c   : > { %p408_p5 = por %p407_p0, %p406_p13 }
  0x5e   : > { %p409_p10 = pnand %p408_p5, %p402_p12 }
  0x60   : > { %412 = shalt.err (!%p409_p10)
}
  0x61   : > { %s413_s5 = scalar_lea.hbm %s648_s27, 128  ;;  %s417_s18 = scalar_lea.hbm %s692_s2, 256 }
  0x62   : > { %p414_p1 = scmp.ne.s32.totalorder %s648_s27, %s413_s5  ;;  %p418_p3 = scmp.lt.u32.totalorder %s648_s27, %s692_s2 }
  0x63   : > { %p419_p4 = scmp.lt.u32.totalorder %s417_s18, %s413_s5  ;;  %p421_p6 = scmp.lt.u32.totalorder %s413_s5, %s648_s27 }
  0x64   : > { %p415_p2 = pnand %p414_p1, %p581_p8 }
  0x65   : > { %p420_p11 = por %p419_p4, %p418_p3 }
  0x66   : > { %p416_p7 = pneg %p415_p2 }
  0x67   : > { %p422_p9 = por %p421_p6, %p420_p11 }
  0x69   : > { %p423_p12 = pnand %p422_p9, %p416_p7 }
  0x6b   : > { %426 = shalt.err (!%p423_p12)
}
  0x6c   : > { %290 = dma.vmem_to_hbm [thread:$0]  (%p581_p8), %s643_s19, 128, %s648_s27, %s177_s29  }
  0x6d PF: > { %s202_s25 = sand.u32 1, %s457_s9   ;;  %p711_p13 = scmp.ne.s32.totalorder %s697_s16, 0 }
  0x6e   : > { %p712_p0 = scmp.ge.s32.totalorder %s469_s12, 2  ;;  %s203_s23 = scalar_lea.sflag [#allocation4], %s202_s25 }
  0x70   : > { %p301_p5 = pnand %p712_p0, %p711_p13 }
  0x72   : > { %452 = dma.done.wait (!%p301_p5), %s203_s23, 128  }
  0x73   : > { %454 = vsyncadd (!%p301_p5), %s203_s23, 4294967168  ;;  %p16_p10 = scmp.ge.s32.totalorder %s537_s20, 4   ;;  %s713_s9 = smov %s461_s10 }
  0x74   : > { %s714_s10 = smov %s465_s11  ;;  %s715_s11 = smov %s573_s7 }
  0x75   : > { %s716_s12 = smov %s537_s20  ;;  %18 = sbr.rel (!%p16_p10) target bundleno = 6 (0x6), region = 77 }
  0x7c   :  { %208 = vsyncpa [#allocation3], 1 }
  0x7d   :  { %210 = vsyncpa [#allocation3 + $0x1], 1 }
  0x7e   :  { %211 = vsyncpa [#allocation6], 1 }
  0x7f   :  { %212 = vsyncpa [#allocation4], 1 }
  0x80   :  { %214 = vsyncpa [#allocation4 + $0x1], 1 }

// kernel: linear_skip.1
= control target key start
LH: loop header
LB: loop body
LE: loop exit
PB: predicated region body
PF: predicated region fallthrough
CT: control target
= control target key end

     0   :  { %vm34_vm0 = vcmask 261120   ;;  %s441_s0 = inlined_call_operand.vmem [shape: f32[16,32], index: 0, kind: input, shape index: {}]   ;;  %s442_s1 = inlined_call_operand.vmem [shape: f32[32,64], index: 1, kind: input, shape index: {}]   ;;  %s443_s2 = inlined_call_operand.vmem [shape: f32[1,64], index: 2, kind: input, shape index: {}]   ;;  %s444_s3 = inlined_call_operand.vmem [shape: f32[64,32], index: 3, kind: input, shape index: {}]   ;;  %s445_s4 = inlined_call_operand.vmem [shape: f32[1,32], index: 4, kind: input, shape index: {}]   ;;  %s446_s5 = inlined_call_operand.hbm [shape: f32[16,32], index: 5, kind: output, shape index: {}]  }
   0x1   :  { %v23_v0 = vld [vmem:[%s442_s1] sm:$0xff]  ;;  %v24_v1 = vld [vmem:[%s442_s1 + $0x8] sm:$0xff]  ;;  %v25_v2 = vld [vmem:[%s442_s1 + $0x10] sm:$0xff] }
   0x2   :  { %v293_v3 = vpack.c.bf16 %v24_v1, %v23_v0  ;;  %v26_v4 = vld [vmem:[%s442_s1 + $0x18] sm:$0xff]  ;;  %v21_v5 = vld [vmem:[%s441_s0] sm:$0xff]  ;;  %v123_v8 = vld [vmem:[%s444_s3 + $0x8] sm:$0xff] }
   0x3   :  { %v297_v6 = vpack.c.bf16 %v26_v4, %v25_v2  ;;  %271 = vmatprep.mubr.msk.f32.mxu0 %vm34_vm0, %v21_v5  ;;  %v122_v7 = vld [vmem:[%s444_s3] sm:$0xff]  ;;  %v124_v9 = vld [vmem:[%s444_s3 + $0x10] sm:$0xff]  ;;  %v125_v11 = vld [vmem:[%s444_s3 + $0x18] sm:$0xff] }
   0x4   :  { %294 = vmatprep.subr.bf16.mxu0 %v293_v3  ;;  %v301_v10 = vpack.c.bf16 %v123_v8, %v122_v7 }
   0x5   :  { %10 = vsyncpa [#allocation3], 0  ;;  %296 = vmatpush3.bf16.msra.mxu0 %v293_v3  ;;  %v305_v12 = vpack.c.bf16 %v125_v11, %v124_v9  ;;  %v22_v13 = vld [vmem:[%s441_s0 + $0x8] sm:$0xff]  ;;  %v126_v14 = vld [vmem:[%s444_s3 + $0x20] sm:$0xff]  ;;  %vm137_vm3 = vcmask 523264  }
   0x6   :  { %298 = vmatprep.subr.bf16.mxu0 %v297_v6  ;;  %302 = vmatprep.subr.bf16.mxu1 %v301_v10  ;;  %v127_v15 = vld [vmem:[%s444_s3 + $0x28] sm:$0xff]  ;;  %v128_v17 = vld [vmem:[%s444_s3 + $0x30] sm:$0xff]  ;;  %v129_v18 = vld [vmem:[%s444_s3 + $0x38] sm:$0xff] }
   0x7   :  { %304 = vmatpush3.bf16.msra.mxu1 %v301_v10  ;;  %v309_v16 = vpack.c.bf16 %v127_v15, %v126_v14  ;;  %v313_v19 = vpack.c.bf16 %v129_v18, %v128_v17  ;;  %v241_v20 = vld [vmem:[%s443_s2] ss:$0 sm:$0xff]  ;;  %s344_s2 = smov [#allocation2]  }
   0x8   :  { %306 = vmatprep.subr.bf16.mxu1 %v305_v12  ;;  %v244_v29 = vld [vmem:[%s445_s4] ss:$0 sm:$0xff]  ;;  %s230_s22 = sshll.u32 %s344_s2, 4  ;;  %s231_s22 = int_to_ptr.vmem [resolvable:$true] %s230_s22 }
   0x9   :  { %300 = vmatpush3.bf16.msra.mxu0 %v297_v6  ;;  %s320_s23 = scalar_lea.vmem %s231_s22, 256  ;;  %p325_p1 = scmp.lt.s32.totalorder %s231_s22, %s231_s22 }
   0xa   :  { %p321_p0 = scmp.ne.s32.totalorder %s231_s22, %s320_s23  ;;  %p326_p2 = scmp.lt.s32.totalorder %s320_s23, %s320_s23 }
   0xb   :  { %308 = vmatpush3.bf16.msra.mxu1 %v305_v12 }
   0xc   :  { %272 = vmatmul.mubr.msk.f32.vlgmr.msra.gmra.mrb[0].mxu0 %vm34_vm0, %v22_v13  ;;  %310 = vmatprep.subr.bf16.mxu1 %v309_v16  ;;  %p327_p3 = por %p326_p2, %p325_p1 }
   0xe   :  { %p328_p4 = pnand %p327_p3, %p321_p0 }
   0xf   :  { %312 = vmatpush3.bf16.msra.mxu1 %v309_v16 }
  0x10   :  { %314 = vmatprep.subr.bf16.mxu1 %v313_v19 }
  0x13   :  { %316 = vmatpush3.bf16.msra.mxu1 %v313_v19 }
  0xdf   :  { %v273_v21 = vpop.f32.mrb[0].mxu0 }
  0xe0   :  { %v113_v22 = vadd.f32 %v273_v21, %v241_v20  ;;  %v107_v23 = vpop.f32.mrb[1].mxu0 }
  0xe1   :  { %v108_v24 = vadd.f32 %v241_v20, %v107_v23 }
  0xe2   :  { %v119_v25 = vmul.f32 0.01, %v113_v22  ;;  %vm117_vm1 = vcmp.ge.f32.partialorder %v113_v22, 0.0 }
  0xe3   :  { %vm116_vm2 = vcmp.ge.f32.partialorder %v108_v24, 0.0  ;;  %v118_v26 = vmul.f32 0.01, %v108_v24 }
  0xe4   :  { %v121_v28 = vsel %vm117_vm1, %v113_v22, %v119_v25 }
  0xe5   :  { %v120_v27 = vsel %vm116_vm2, %v108_v24, %v118_v26 }
  0xe6   :  { %290 = vmatprep.mubr.msk.f32.mxu1 %vm137_vm3, %v120_v27 }
  0xe7   :  { %291 = vmatmul.mubr.msk.f32.vlgmr.msra.gmra.mrb[0].mxu1 %vm137_vm3, %v121_v28 }
 0x1ba   :  { %v292_v30 = vpop.f32.mrb[0].mxu1 }
 0x1bb   :  { %v216_v31 = vadd.f32 %v292_v30, %v244_v29  ;;  %v210_v32 = vpop.f32.mrb[1].mxu1 }
 0x1bc   :  { %v211_v33 = vadd.f32 %v244_v29, %v210_v32 }
 0x1bd   :  { %v220_v34 = vadd.f32 %v216_v31, %v22_v13 }
 0x1be   :  { %v219_v35 = vadd.f32 %v211_v33, %v21_v5 }
 0x1bf   :  { %v222_v36 = vmul.f32 0.5, %v220_v34 }
 0x1c0   :  { %v221_v37 = vmul.f32 0.5, %v219_v35 }
 0x1c1   :  { %224 = vst.msk [vmem:[#allocation2 + $0x8] sm:$0xff] %vm34_vm0, %v222_v36 }
 0x1c2   :  { %223 = vst.msk [vmem:[#allocation2] sm:$0xff] %vm34_vm0, %v221_v37 }
 0x1c3   :  { %331 = shalt.err (!%p328_p4)
}
 0x1c4   :  { %s332_s25 = scalar_lea.hbm %s446_s5, 256 }
 0x1c5   :  { %p333_p5 = scmp.ne.s32.totalorder %s446_s5, %s332_s25  ;;  %p336_p6 = scmp.lt.u32.totalorder %s332_s25, %s446_s5 }
 0x1c7   :  { %p338_p7 = pnand %p336_p6, %p333_p5 }
 0x1c9   :  { %341 = shalt.err (!%p338_p7)
}
 0x1ca   :  { %s345_s30 = smov 128   ;;  %s346_s6 = smov 8  }
 0x1cb   :  { %236 = dma.vmem_to_hbm [thread:$0]  %s231_s22, 256, %s446_s5, [#allocation3], %s345_s30, %s345_s30, %s346_s6  }
 0x1cc   :  { %342 = dma.done.wait [#allocation3], 256  }
 0x1cd   :  { %343 = vsyncadd [#allocation3], 4294967040 }
 0x1ce   :  { %240 = vsyncpa [#allocation3], 1 }

</bundles_post_ra>
